<compile_context>
chip_gen: v5e
topology: v5e:2x2
jax: 0.10.0
libtpu: 0.0.40
codegen_flags: <defaults>
</compile_context>

<pallas_src>
import jax
import jax.numpy as jnp
from jax.experimental import pallas as pl
from jax.experimental.pallas import tpu as pltpu


def _const_fill_kernel(val_ref, out_ref):
    # val_ref: (1,) scalar in SMEM;  out_ref: (bm, bn) VMEM output tile.
    # Single vector-immediate broadcast + full-width (lane-dense) stores.
    out_ref[...] = jnp.full(out_ref.shape, val_ref[0], dtype=out_ref.dtype)


def _const_pallas(shape, dtype, val):
    B, T = shape
    # Lane-dense tile sizes: bn is a multiple of 128, block <= 256x2048 f32
    # (2 MiB) so the double-buffered output fits every generation's scoped
    # VMEM (v5e 16 MiB default, v7x 64 MiB physical) with lots of headroom.
    bn = min(T, 2048)
    bm = min(B, 256)
    grid = (pl.cdiv(B, bm), pl.cdiv(T, bn))

    return pl.pallas_call(
        _const_fill_kernel,
        out_shape=jax.ShapeDtypeStruct((B, T), dtype),
        grid=grid,
        in_specs=[pl.BlockSpec(memory_space=pltpu.MemorySpace.SMEM)],
        out_specs=pl.BlockSpec((bm, bn), lambda i, j: (i, j)),
        compiler_params=pltpu.CompilerParams(
            dimension_semantics=("parallel", "parallel"),
        ),
    )(jnp.asarray([val], dtype=jnp.float32))


def const_forward(src, tgt, val):
    """JAX/Pallas equivalent of const(val).forward(src, tgt)."""
    del src  # unused by the reference forward
    B, T = tgt.shape
    # Tiny or non-lane-aligned shapes: per-pallas_call fixed overhead and
    # masked partial stores dwarf the work — let XLA emit the fill directly.
    if (T % 128 != 0) or (T < 128) or (B < 8):
        return jnp.full(tgt.shape, val, dtype=tgt.dtype)
    return _const_pallas(tgt.shape, tgt.dtype, val)


if __name__ == "__main__":
    key = jax.random.PRNGKey(0)
    k_src, k_tgt, k_src2, k_tgt2 = jax.random.split(key, 4)

    VAL = 3.5

    # Small shape consistent with the module's (src, tgt) signature — takes
    # the fast jnp bypass path.
    B, T = 2, 8
    src = jax.random.normal(k_src, (B, T), dtype=jnp.float32)
    tgt = jax.random.normal(k_tgt, (B, T), dtype=jnp.float32)
    out_small = jax.block_until_ready(const_forward(src, tgt, VAL))
    ref_small = jnp.full((B, T), VAL, dtype=jnp.float32)
    assert out_small.shape == (B, T) and out_small.dtype == tgt.dtype
    assert jnp.allclose(out_small, ref_small), "small-shape mismatch"

    # Modest lane-dense shape that exercises the Pallas kernel path.
    B2, T2 = 16, 256
    src2 = jax.random.normal(k_src2, (B2, T2), dtype=jnp.float32)
    tgt2 = jax.random.normal(k_tgt2, (B2, T2), dtype=jnp.float32)
    out_big = jax.block_until_ready(const_forward(src2, tgt2, VAL))
    ref_big = jnp.full((B2, T2), VAL, dtype=jnp.float32)
    assert out_big.shape == (B2, T2) and out_big.dtype == tgt2.dtype
    assert jnp.allclose(out_big, ref_big), "pallas-path mismatch"

    print("KERNEL_OK")
</pallas_src>

<mosaic_0001>
module attributes {stable_mosaic.version = 11 : i64} {
  func.func @_const_fill_kernel(%arg0: i32, %arg1: i32, %arg2: memref<1xf32, #tpu.memory_space<smem>>, %arg3: memref<16x256xf32, #tpu.memory_space<vmem>>) attributes {dimension_semantics = [#tpu.dimension_semantics<parallel>, #tpu.dimension_semantics<parallel>], iteration_bounds = array<i64: 1, 1>, scalar_prefetch = 0 : i64, scratch_operands = 0 : i64, tpu.core_type = #tpu.core_type<tc>, window_params = [{transform_indices = @transform_0, window_bounds = array<i64: 1>}, {transform_indices = @transform_1, window_bounds = array<i64: 16, 256>}]} {
    %c0 = arith.constant 0 : index
    %0 = memref.load %arg2[%c0] : memref<1xf32, #tpu.memory_space<smem>>
    %1 = vector.broadcast %0 : f32 to vector<16x256xf32>
    %c0_0 = arith.constant 0 : index
    %c0_1 = arith.constant 0 : index
    %2 = vector.load %arg3[%c0_0, %c0_1] : memref<16x256xf32, #tpu.memory_space<vmem>>, vector<16x256xf32>
    tpu.vector_store %arg3[%c0_0, %c0_1], %1 {strides = array<i32>} : memref<16x256xf32, #tpu.memory_space<vmem>>, vector<16x256xf32>,
    return
  }
  func.func @transform_0(%arg0: i32, %arg1: i32) -> i32 {
    %c0_i32 = arith.constant 0 : i32
    %c0_i32_0 = arith.constant 0 : i32
    return %c0_i32 : i32
  }
  func.func @transform_1(%arg0: i32, %arg1: i32) -> (i32, i32) {
    %c0_i32 = arith.constant 0 : i32
    return %arg0, %arg1 : i32, i32
  }
}

</mosaic_0001>

<bundles_post_ra>
// kernel: tpu_custom_call.1
= control target key start
LH: loop header
LB: loop body
LE: loop exit
PB: predicated region body
PF: predicated region fallthrough
CT: control target
= control target key end

     0   :  { %s82_s0 = inlined_call_operand.<no memory space> [shape: f32[1], index: 0, kind: input, shape index: {}]   ;;  %s83_s1 = inlined_call_operand.hbm [shape: f32[16,256], index: 1, kind: output, shape index: {}]  }
   0x1   :  { %v11_v0 = vstv %s82_s0 }
   0x2   :  { %7 = vsyncpa [#allocation4], 0  ;;  %s22_s10 = sshll.u32 %s83_s1, 4  ;;  %12 = vst [vmem:[#allocation3] sm:$0xff] %v11_v0  ;;  %s63_s11 = smov [#allocation3]   ;;  %s23_s10 = int_to_ptr.hbm [resolvable:$true] %s22_s10 }
   0x3   :  { %s20_s12 = sshll.u32 %s63_s11, 4  ;;  %13 = vst [vmem:[#allocation3 + $0x8] sm:$0xff] %v11_v0  ;;  %s64_s13 = smov 256   ;;  %s21_s12 = int_to_ptr.vmem [resolvable:$true] %s20_s12 }
   0x4   :  { %14 = vst [vmem:[#allocation3 + $0x10] sm:$0xff] %v11_v0  ;;  %s65_s14 = smov 16  }
   0x5   :  { %15 = vst [vmem:[#allocation3 + $0x18] sm:$0xff] %v11_v0 }
   0x6   :  { %28 = dma.vmem_to_hbm [thread:$0]  %s21_s12, 512, %s23_s10, [#allocation4], %s64_s13, %s64_s13, %s65_s14  }
   0x7   :  { %61 = dma.done.wait [#allocation4], 512  }
   0x8   :  { %62 = vsyncadd [#allocation4], 4294966784 }
   0x9   :  { %33 = vsyncpa [#allocation4], 1 }

</bundles_post_ra>
